<compile_context>
chip_gen: v7x
topology: tpu7x:2x2x1
jax: 0.10.0
libtpu: 0.0.40
codegen_flags: <defaults>
</compile_context>

<pallas_src>
import math

import jax
import jax.numpy as jnp
from jax.experimental import pallas as pl
from jax.experimental.pallas import tpu as pltpu

_LANES = 128          # lane-dense last dim (multiple of 128 -> unmasked vst)
_TM_TARGET = 1024     # row tile; f32 block = 512 KiB, well under scoped VMEM
_PALLAS_MIN_ELEMENTS = 1 << 20  # below this, fused XLA elementwise wins


def _elementwise_kernel(x_ref, y_ref,
                        add_ref, sub_ref, mul_ref, div_ref, cmp_ref):
    x = x_ref[...]
    y = y_ref[...]
    add_ref[...] = x + y
    sub_ref[...] = x - y
    mul_ref[...] = x * y
    # Matches torch.div(x, torch.add(y, 1e-05)) exactly (epsilon is part of
    # the original module's semantics).
    div_ref[...] = x / (y + 1e-05)
    # Pack the three comparisons into a single uint8 bitfield (bit0=gt,
    # bit1=lt, bit2=eq): one store instead of three.
    code = (jnp.where(x > y, 1, 0)
            + jnp.where(x < y, 2, 0)
            + jnp.where(x == y, 4, 0))
    cmp_ref[...] = code.astype(jnp.uint8)


def _round_up(v, m):
    return ((v + m - 1) // m) * m


def _pallas_elementwise(x2d, y2d, tm):
    m_pad, lanes = x2d.shape
    grid = (m_pad // tm,)

    f32_spec = pl.BlockSpec((tm, lanes), lambda i: (i, 0))
    u8_spec = pl.BlockSpec((tm, lanes), lambda i: (i, 0))

    out_shape = (
        jax.ShapeDtypeStruct((m_pad, lanes), jnp.float32),  # add
        jax.ShapeDtypeStruct((m_pad, lanes), jnp.float32),  # sub
        jax.ShapeDtypeStruct((m_pad, lanes), jnp.float32),  # mul
        jax.ShapeDtypeStruct((m_pad, lanes), jnp.float32),  # div
        jax.ShapeDtypeStruct((m_pad, lanes), jnp.uint8),    # packed gt/lt/eq
    )

    return pl.pallas_call(
        _elementwise_kernel,
        out_shape=out_shape,
        grid_spec=pltpu.PrefetchScalarGridSpec(
            num_scalar_prefetch=0,
            grid=grid,
            in_specs=[f32_spec, f32_spec],
            out_specs=[f32_spec, f32_spec, f32_spec, f32_spec, u8_spec],
        ),
        compiler_params=pltpu.CompilerParams(
            dimension_semantics=("parallel",),
        ),
    )(x2d, y2d)


def pt_module_forward(input_tensor1, input_tensor2, use_pallas=None):
    # Broadcast to a common shape (the PyTorch module relies on positional
    # broadcasting; for the test both inputs have the same shape).
    out_shape = jnp.broadcast_shapes(input_tensor1.shape, input_tensor2.shape)
    x = jnp.broadcast_to(input_tensor1, out_shape).astype(jnp.float32)
    y = jnp.broadcast_to(input_tensor2, out_shape).astype(jnp.float32)

    total = math.prod(out_shape) if out_shape else 1

    if use_pallas is None:
        use_pallas = total >= _PALLAS_MIN_ELEMENTS

    if not use_pallas:
        # Tiny workload: pallas_call launch/DMA overhead dominates; let XLA
        # fuse the elementwise ops.
        return (
            x + y,
            x - y,
            x * y,
            x / (y + 1e-05),
            x > y,
            x < y,
            x == y,
        )

    # --- Pallas path: flatten to a padded lane-dense (M, 128) slab. ---
    flat_len = _round_up(max(total, 1), _LANES)
    m = flat_len // _LANES
    # Row tile: multiple of 32 (uint8 sublane tiling) and of 8 (f32 tiling).
    tm = _TM_TARGET if m > _TM_TARGET else _round_up(m, 32)
    m_pad = _round_up(m, tm)
    pad = m_pad * _LANES - total

    xf = jnp.pad(x.reshape(-1), (0, pad)).reshape(m_pad, _LANES)
    yf = jnp.pad(y.reshape(-1), (0, pad)).reshape(m_pad, _LANES)

    add, sub, mul, div, cmp = _pallas_elementwise(xf, yf, tm)

    def _unflat(a):
        return a.reshape(-1)[:total].reshape(out_shape)

    cmp_flat = cmp.reshape(-1)[:total].reshape(out_shape)
    gt = (cmp_flat & 1).astype(jnp.bool_)
    lt = ((cmp_flat >> 1) & 1).astype(jnp.bool_)
    eq = ((cmp_flat >> 2) & 1).astype(jnp.bool_)

    return (
        _unflat(add),
        _unflat(sub),
        _unflat(mul),
        _unflat(div),
        gt,
        lt,
        eq,
    )


if __name__ == "__main__":
    key = jax.random.PRNGKey(0)
    k1, k2 = jax.random.split(key)
    shape = (2, 4, 16, 16)  # NCHW
    x = jax.random.normal(k1, shape, dtype=jnp.float32)
    y = jax.random.normal(k2, shape, dtype=jnp.float32)
    # Make some entries exactly equal so the == output is non-trivial.
    y = y.at[0, 0, :4, :4].set(x[0, 0, :4, :4])

    # Force the Pallas path so the kernel is exercised even at this tiny shape
    # (the default heuristic would use the fused-jnp fallback here).
    outs = pt_module_forward(x, y, use_pallas=True)
    outs = jax.block_until_ready(outs)

    # Reference check against plain JAX.
    ref = (
        x + y,
        x - y,
        x * y,
        x / (y + 1e-05),
        x > y,
        x < y,
        x == y,
    )
    for o, r in zip(outs, ref):
        assert o.shape == r.shape, (o.shape, r.shape)
        assert o.dtype == r.dtype, (o.dtype, r.dtype)
        if o.dtype == jnp.bool_:
            assert bool(jnp.all(o == r))
        else:
            assert bool(jnp.allclose(o, r, rtol=1e-6, atol=1e-6))

    print("KERNEL_OK")
</pallas_src>

<mosaic_0001>
module attributes {stable_mosaic.version = 11 : i64} {
  func.func @_elementwise_kernel(%arg0: i32, %arg1: memref<32x128xf32, #tpu.memory_space<vmem>>, %arg2: memref<32x128xf32, #tpu.memory_space<vmem>>, %arg3: memref<32x128xf32, #tpu.memory_space<vmem>>, %arg4: memref<32x128xf32, #tpu.memory_space<vmem>>, %arg5: memref<32x128xf32, #tpu.memory_space<vmem>>, %arg6: memref<32x128xf32, #tpu.memory_space<vmem>>, %arg7: memref<32x128xi8, #tpu.memory_space<vmem>>) attributes {dimension_semantics = [#tpu.dimension_semantics<parallel>], iteration_bounds = array<i64: 1>, scalar_prefetch = 0 : i64, scratch_operands = 0 : i64, tpu.core_type = #tpu.core_type<tc>, window_params = [{transform_indices = @transform_0, window_bounds = array<i64: 32, 128>}, {transform_indices = @transform_1, window_bounds = array<i64: 32, 128>}, {transform_indices = @transform_2, window_bounds = array<i64: 32, 128>}, {transform_indices = @transform_3, window_bounds = array<i64: 32, 128>}, {transform_indices = @transform_4, window_bounds = array<i64: 32, 128>}, {transform_indices = @transform_5, window_bounds = array<i64: 32, 128>}, {transform_indices = @transform_6, window_bounds = array<i64: 32, 128>}]} {
    %c0 = arith.constant 0 : index
    %c0_0 = arith.constant 0 : index
    %0 = vector.load %arg1[%c0, %c0_0] : memref<32x128xf32, #tpu.memory_space<vmem>>, vector<32x128xf32>
    %c0_1 = arith.constant 0 : index
    %c0_2 = arith.constant 0 : index
    %1 = vector.load %arg2[%c0_1, %c0_2] : memref<32x128xf32, #tpu.memory_space<vmem>>, vector<32x128xf32>
    %2 = arith.addf %0, %1 : vector<32x128xf32>
    %c0_3 = arith.constant 0 : index
    %c0_4 = arith.constant 0 : index
    %3 = vector.load %arg3[%c0_3, %c0_4] : memref<32x128xf32, #tpu.memory_space<vmem>>, vector<32x128xf32>
    tpu.vector_store %arg3[%c0_3, %c0_4], %2 {strides = array<i32>} : memref<32x128xf32, #tpu.memory_space<vmem>>, vector<32x128xf32>,
    %4 = arith.subf %0, %1 : vector<32x128xf32>
    %c0_5 = arith.constant 0 : index
    %c0_6 = arith.constant 0 : index
    %5 = vector.load %arg4[%c0_5, %c0_6] : memref<32x128xf32, #tpu.memory_space<vmem>>, vector<32x128xf32>
    tpu.vector_store %arg4[%c0_5, %c0_6], %4 {strides = array<i32>} : memref<32x128xf32, #tpu.memory_space<vmem>>, vector<32x128xf32>,
    %6 = arith.mulf %0, %1 : vector<32x128xf32>
    %c0_7 = arith.constant 0 : index
    %c0_8 = arith.constant 0 : index
    %7 = vector.load %arg5[%c0_7, %c0_8] : memref<32x128xf32, #tpu.memory_space<vmem>>, vector<32x128xf32>
    tpu.vector_store %arg5[%c0_7, %c0_8], %6 {strides = array<i32>} : memref<32x128xf32, #tpu.memory_space<vmem>>, vector<32x128xf32>,
    %cst = arith.constant 9.99999974E-6 : f32
    %8 = vector.broadcast %cst : f32 to vector<32x128xf32>
    %9 = arith.addf %1, %8 : vector<32x128xf32>
    %10 = arith.divf %0, %9 : vector<32x128xf32>
    %c0_9 = arith.constant 0 : index
    %c0_10 = arith.constant 0 : index
    %11 = vector.load %arg6[%c0_9, %c0_10] : memref<32x128xf32, #tpu.memory_space<vmem>>, vector<32x128xf32>
    tpu.vector_store %arg6[%c0_9, %c0_10], %10 {strides = array<i32>} : memref<32x128xf32, #tpu.memory_space<vmem>>, vector<32x128xf32>,
    %12 = arith.cmpf ogt, %0, %1 : vector<32x128xf32>
    %c1_i32 = arith.constant 1 : i32
    %c0_i32 = arith.constant 0 : i32
    %13 = vector.broadcast %c1_i32 : i32 to vector<32x128xi32>
    %14 = vector.broadcast %c0_i32 : i32 to vector<32x128xi32>
    %15 = arith.select %12, %13, %14 : vector<32x128xi1>, vector<32x128xi32>
    %16 = arith.cmpf olt, %0, %1 : vector<32x128xf32>
    %c2_i32 = arith.constant 2 : i32
    %c0_i32_11 = arith.constant 0 : i32
    %17 = vector.broadcast %c2_i32 : i32 to vector<32x128xi32>
    %18 = vector.broadcast %c0_i32_11 : i32 to vector<32x128xi32>
    %19 = arith.select %16, %17, %18 : vector<32x128xi1>, vector<32x128xi32>
    %20 = arith.addi %15, %19 : vector<32x128xi32>
    %21 = arith.cmpf oeq, %0, %1 : vector<32x128xf32>
    %c4_i32 = arith.constant 4 : i32
    %c0_i32_12 = arith.constant 0 : i32
    %22 = vector.broadcast %c4_i32 : i32 to vector<32x128xi32>
    %23 = vector.broadcast %c0_i32_12 : i32 to vector<32x128xi32>
    %24 = arith.select %21, %22, %23 : vector<32x128xi1>, vector<32x128xi32>
    %25 = arith.addi %20, %24 : vector<32x128xi32>
    %26 = arith.trunci %25 : vector<32x128xi32> to vector<32x128xi8>
    %c0_13 = arith.constant 0 : index
    %c0_14 = arith.constant 0 : index
    %27 = vector.load %arg7[%c0_13, %c0_14] : memref<32x128xi8, #tpu.memory_space<vmem>>, vector<32x128xi8>
    tpu.vector_store %arg7[%c0_13, %c0_14], %26 {strides = array<i32>} : memref<32x128xi8, #tpu.memory_space<vmem>>, vector<32x128xi8>,
    return
  }
  func.func @transform_0(%arg0: i32) -> (i32, i32) {
    %c0_i32 = arith.constant 0 : i32
    %c0_i32_0 = arith.constant 0 : i32
    return %arg0, %c0_i32 : i32, i32
  }
  func.func @transform_1(%arg0: i32) -> (i32, i32) {
    %c0_i32 = arith.constant 0 : i32
    %c0_i32_0 = arith.constant 0 : i32
    return %arg0, %c0_i32 : i32, i32
  }
  func.func @transform_2(%arg0: i32) -> (i32, i32) {
    %c0_i32 = arith.constant 0 : i32
    %c0_i32_0 = arith.constant 0 : i32
    return %arg0, %c0_i32 : i32, i32
  }
  func.func @transform_3(%arg0: i32) -> (i32, i32) {
    %c0_i32 = arith.constant 0 : i32
    %c0_i32_0 = arith.constant 0 : i32
    return %arg0, %c0_i32 : i32, i32
  }
  func.func @transform_4(%arg0: i32) -> (i32, i32) {
    %c0_i32 = arith.constant 0 : i32
    %c0_i32_0 = arith.constant 0 : i32
    return %arg0, %c0_i32 : i32, i32
  }
  func.func @transform_5(%arg0: i32) -> (i32, i32) {
    %c0_i32 = arith.constant 0 : i32
    %c0_i32_0 = arith.constant 0 : i32
    return %arg0, %c0_i32 : i32, i32
  }
  func.func @transform_6(%arg0: i32) -> (i32, i32) {
    %c0_i32 = arith.constant 0 : i32
    %c0_i32_0 = arith.constant 0 : i32
    return %arg0, %c0_i32 : i32, i32
  }
}

</mosaic_0001>

<bundles_post_ra>
// kernel: tpu_custom_call.1
= control target key start
LH: loop header
LB: loop body
LE: loop exit
PB: predicated region body
PF: predicated region fallthrough
CT: control target
= control target key end

     0   :  { %12 = vsyncpa [#allocation3], 0  ;;  %s655_s0 = inlined_call_operand.hbm [shape: f32[32,128], index: 0, kind: input, shape index: {}]   ;;  %s656_s1 = inlined_call_operand.hbm [shape: f32[32,128], index: 1, kind: input, shape index: {}]   ;;  %s657_s2 = inlined_call_operand.hbm [shape: f32[32,128], index: 2, kind: output, shape index: {0}]   ;;  %s658_s3 = inlined_call_operand.hbm [shape: f32[32,128], index: 3, kind: output, shape index: {1}]   ;;  %s659_s4 = inlined_call_operand.hbm [shape: f32[32,128], index: 4, kind: output, shape index: {2}]   ;;  %s660_s5 = inlined_call_operand.hbm [shape: f32[32,128], index: 5, kind: output, shape index: {3}]   ;;  %s661_s6 = inlined_call_operand.hbm [shape: u8[32,128], index: 6, kind: output, shape index: {4}]  }
   0x1   :  { %13 = vsyncpa [#allocation6], 0 }
   0x2   :  { %14 = vsyncpa [#allocation4], 0 }
   0x3   :  { %15 = vsyncpa [#allocation9], 0 }
   0x4   :  { %16 = vsyncpa [#allocation12], 0  ;;  %s391_s21 = smov [#allocation2]   ;;  %s227_s25 = scalar_lea.hbm %s655_s0, 512 }
   0x5   :  { %s22_s22 = sshll.u32 %s391_s21, 4  ;;  %p228_p0 = scmp.ne.s32.totalorder %s655_s0, %s227_s25  ;;  %s23_s22 = int_to_ptr.vmem [resolvable:$true] %s22_s22 }
   0x6   :  { %p231_p1 = scmp.lt.u32.totalorder %s227_s25, %s655_s0 }
   0x8   :  { %p233_p2 = pnand %p231_p1, %p228_p0 }
   0xa   :  { %236 = shalt.err (!%p233_p2)
}
   0xb   :  { %s237_s30 = scalar_lea.vmem %s23_s22, 512  ;;  %p242_p4 = scmp.lt.s32.totalorder %s23_s22, %s23_s22 }
   0xc   :  { %p238_p3 = scmp.ne.s32.totalorder %s23_s22, %s237_s30  ;;  %p243_p5 = scmp.lt.s32.totalorder %s237_s30, %s237_s30 }
   0xe   :  { %p244_p6 = por %p243_p5, %p242_p4 }
  0x10   :  { %p245_p7 = pnand %p244_p6, %p238_p3 }
  0x12   :  { %248 = shalt.err (!%p245_p7)
}
  0x13   :  { %s392_s7 = smov 128   ;;  %s393_s8 = smov 8  }
  0x14   :  { %28 = dma.hbm_to_vmem [thread:$0]  %s655_s0, 512, %s23_s22, [#allocation3], %s392_s7, %s392_s7, %s393_s8  }
  0x15   :  { %s394_s11 = smov [#allocation5]   ;;  %s249_s15 = scalar_lea.hbm %s656_s1, 512 }
  0x16   :  { %s34_s12 = sshll.u32 %s394_s11, 4  ;;  %p250_p8 = scmp.ne.s32.totalorder %s656_s1, %s249_s15  ;;  %s35_s12 = int_to_ptr.vmem [resolvable:$true] %s34_s12 }
  0x17   :  { %p253_p9 = scmp.lt.u32.totalorder %s249_s15, %s656_s1 }
  0x19   :  { %p255_p10 = pnand %p253_p9, %p250_p8 }
  0x1b   :  { %258 = shalt.err (!%p255_p10)
}
  0x1c   :  { %s259_s20 = scalar_lea.vmem %s35_s12, 512  ;;  %p264_p12 = scmp.lt.s32.totalorder %s35_s12, %s35_s12 }
  0x1d   :  { %p260_p11 = scmp.ne.s32.totalorder %s35_s12, %s259_s20  ;;  %p265_p13 = scmp.lt.s32.totalorder %s259_s20, %s259_s20 }
  0x1f   :  { %p266_p0 = por %p265_p13, %p264_p12 }
  0x21   :  { %p267_p1 = pnand %p266_p0, %p260_p11 }
  0x23   :  { %270 = shalt.err (!%p267_p1)
}
  0x24   :  { %40 = dma.hbm_to_vmem [thread:$0]  %s656_s1, 512, %s35_s12, [#allocation6], %s392_s7, %s392_s7, %s393_s8  }
  0x25   :  { %381 = dma.done.wait [#allocation3], 512  }
  0x26   :  { %382 = vsyncadd [#allocation3], 4294966784 }
  0x27   :  { %383 = dma.done.wait [#allocation6], 512  }
  0x28   :  { %384 = vsyncadd [#allocation6], 4294966784  ;;  %v466_v0 = vld [vmem:[#allocation2] sm:$0xff]  ;;  %v470_v2 = vld [vmem:[#allocation2 + $0x8] sm:$0xff]  ;;  %s395_s22 = smov [#allocation8]   ;;  %s396_s24 = smov [#allocation7]  }
  0x29   :  { %v468_v1 = vld [vmem:[#allocation5] sm:$0xff]  ;;  %s148_s23 = sshll.u32 %s395_s22, 4  ;;  %s136_s25 = sshll.u32 %s396_s24, 4  ;;  %v474_v4 = vld [vmem:[#allocation5 + $0x8] sm:$0xff]  ;;  %v476_v5 = vld [vmem:[#allocation2 + $0x10] sm:$0xff]  ;;  %s500_s23 = int_to_ptr.vmem [resolvable:$true] %s148_s23  ;;  %s508_s25 = int_to_ptr.vmem [resolvable:$true] %s136_s25 }
  0x2a   :  { %v63_v3 = vsub.f32 %v466_v0, %v468_v1  ;;  %v478_v6 = vld [vmem:[#allocation5 + $0x10] sm:$0xff]  ;;  %v79_v7 = vadd.f32 1e-05, %v468_v1  ;;  %v55_v8 = vadd.f32 %v468_v1, %v466_v0  ;;  %v71_v9 = vmul.f32 %v468_v1, %v466_v0  ;;  %s397_s1 = smov [#allocation10]   ;;  %v489_v12 = vld [vmem:[#allocation2 + $0x18] sm:$0xff]  ;;  %s271_s27 = scalar_lea.vmem %s500_s23, 512 }
  0x2b   :  { %s160_s26 = sshll.u32 %s397_s1, 4  ;;  %v64_v10 = vsub.f32 %v470_v2, %v474_v4  ;;  %v65_v11 = vsub.f32 %v476_v5, %v478_v6  ;;  %v491_v13 = vld [vmem:[#allocation5 + $0x18] sm:$0xff]  ;;  %v80_v14 = vadd.f32 1e-05, %v474_v4  ;;  %v81_v15 = vadd.f32 1e-05, %v478_v6  ;;  %p272_p2 = scmp.ne.s32.totalorder %s500_s23, %s271_s27  ;;  %s516_s26 = int_to_ptr.vmem [resolvable:$true] %s160_s26 }
  0x2c   :  { %67 = vst [vmem:[#allocation8] sm:$0xff] %v63_v3  ;;  %v66_v16 = vsub.f32 %v489_v12, %v491_v13  ;;  %219 = vrcp.f32 %v79_v7  ;;  %v82_v17 = vadd.f32 1e-05, %v491_v13  ;;  %59 = vst [vmem:[#allocation7] sm:$0xff] %v55_v8  ;;  %v56_v18 = vadd.f32 %v474_v4, %v470_v2  ;;  %p276_p3 = scmp.lt.s32.totalorder %s500_s23, %s500_s23  ;;  %p277_p4 = scmp.lt.s32.totalorder %s271_s27, %s271_s27 }
  0x2d   :  { %75 = vst [vmem:[#allocation10] sm:$0xff] %v71_v9  ;;  %68 = vst [vmem:[#allocation8 + $0x8] sm:$0xff] %v64_v10  ;;  %221 = vrcp.f32 %v80_v14  ;;  %v57_v19 = vadd.f32 %v478_v6, %v476_v5  ;;  %v58_v20 = vadd.f32 %v491_v13, %v489_v12  ;;  %v72_v21 = vmul.f32 %v474_v4, %v470_v2 }
  0x2e   :  { %69 = vst [vmem:[#allocation8 + $0x10] sm:$0xff] %v65_v11  ;;  %70 = vst [vmem:[#allocation8 + $0x18] sm:$0xff] %v66_v16  ;;  %223 = vrcp.f32 %v81_v15  ;;  %v73_v22 = vmul.f32 %v478_v6, %v476_v5  ;;  %v74_v23 = vmul.f32 %v491_v13, %v489_v12  ;;  %vm95_vm0 = vcmp.gt.f32.partialorder %v466_v0, %v468_v1  ;;  %p278_p5 = por %p277_p4, %p276_p3 }
  0x2f   :  { %60 = vst [vmem:[#allocation7 + $0x8] sm:$0xff] %v56_v18  ;;  %225 = vrcp.f32 %v82_v17  ;;  %61 = vst [vmem:[#allocation7 + $0x10] sm:$0xff] %v57_v19  ;;  %vm96_vm1 = vcmp.gt.f32.partialorder %v470_v2, %v474_v4  ;;  %vm97_vm2 = vcmp.gt.f32.partialorder %v476_v5, %v478_v6  ;;  %vm98_vm3 = vcmp.gt.f32.partialorder %v489_v12, %v491_v13 }
  0x30   :  { %62 = vst [vmem:[#allocation7 + $0x18] sm:$0xff] %v58_v20  ;;  %76 = vst [vmem:[#allocation10 + $0x8] sm:$0xff] %v72_v21  ;;  %p279_p6 = pnand %p278_p5, %p272_p2 }
  0x32   :  { %282 = shalt.err (!%p279_p6)
}
  0x33   :  { %s283_s30 = scalar_lea.hbm %s658_s3, 512 }
  0x34   :  { %p284_p7 = scmp.ne.s32.totalorder %s658_s3, %s283_s30  ;;  %p287_p8 = scmp.lt.u32.totalorder %s283_s30, %s658_s3 }
  0x36   :  { %p289_p9 = pnand %p287_p8, %p284_p7 }
  0x38   :  { %292 = shalt.err (!%p289_p9)
}
  0x39   :  { %154 = dma.vmem_to_hbm [thread:$0]  %s500_s23, 512, %s658_s3, [#allocation9], %s392_s7, %s392_s7, %s393_s8   ;;  %77 = vst [vmem:[#allocation10 + $0x10] sm:$0xff] %v73_v22  ;;  %78 = vst [vmem:[#allocation10 + $0x18] sm:$0xff] %v74_v23  ;;  %v398_v24 = vmov 0  }
  0x3a   :  { %v99_v25 = vsel %vm95_vm0, 1, %v398_v24  ;;  %v100_v26 = vsel %vm96_vm1, 1, %v398_v24  ;;  %v101_v27 = vsel %vm97_vm2, 1, %v398_v24  ;;  %v102_v28 = vsel %vm98_vm3, 1, %v398_v24  ;;  %s293_s3 = scalar_lea.vmem %s508_s25, 512  ;;  %p298_p11 = scmp.lt.s32.totalorder %s508_s25, %s508_s25 }
  0x3b   :  { %p294_p10 = scmp.ne.s32.totalorder %s508_s25, %s293_s3  ;;  %p299_p12 = scmp.lt.s32.totalorder %s293_s3, %s293_s3 }
  0x3d   :  { %p300_p13 = por %p299_p12, %p298_p11 }
  0x3f   :  { %p301_p0 = pnand %p300_p13, %p294_p10 }
  0x41   :  { %304 = shalt.err (!%p301_p0)
}
  0x42   :  { %s305_s17 = scalar_lea.hbm %s657_s2, 512 }
  0x43   :  { %p306_p1 = scmp.ne.s32.totalorder %s657_s2, %s305_s17  ;;  %p309_p2 = scmp.lt.u32.totalorder %s305_s17, %s657_s2 }
  0x45   :  { %p311_p3 = pnand %p309_p2, %p306_p1 }
  0x47   :  { %314 = shalt.err (!%p311_p3)
}
  0x48   :  { %142 = dma.vmem_to_hbm [thread:$0]  %s508_s25, 512, %s657_s2, [#allocation4], %s392_s7, %s392_s7, %s393_s8   ;;  %vm103_vm4 = vcmp.lt.f32.partialorder %v466_v0, %v468_v1  ;;  %vm104_vm5 = vcmp.lt.f32.partialorder %v470_v2, %v474_v4  ;;  %vm105_vm6 = vcmp.lt.f32.partialorder %v476_v5, %v478_v6  ;;  %vm106_vm7 = vcmp.lt.f32.partialorder %v489_v12, %v491_v13 }
  0x49   :  { %s315_s23 = scalar_lea.vmem %s516_s26, 512  ;;  %p320_p5 = scmp.lt.s32.totalorder %s516_s26, %s516_s26 }
  0x4a   :  { %p316_p4 = scmp.ne.s32.totalorder %s516_s26, %s315_s23  ;;  %p321_p6 = scmp.lt.s32.totalorder %s315_s23, %s315_s23 }
  0x4c   :  { %p322_p7 = por %p321_p6, %p320_p5 }
  0x4e   :  { %p323_p8 = pnand %p322_p7, %p316_p4 }
  0x50   :  { %326 = shalt.err (!%p323_p8)
}
  0x51   :  { %s327_s25 = scalar_lea.hbm %s659_s4, 512 }
  0x52   :  { %p328_p9 = scmp.ne.s32.totalorder %s659_s4, %s327_s25  ;;  %p331_p10 = scmp.lt.u32.totalorder %s327_s25, %s659_s4 }
  0x54   :  { %p333_p11 = pnand %p331_p10, %p328_p9 }
  0x56   :  { %336 = shalt.err (!%p333_p11)
}
  0x57   :  { %166 = dma.vmem_to_hbm [thread:$0]  %s516_s26, 512, %s659_s4, [#allocation9], %s392_s7, %s392_s7, %s393_s8   ;;  %v107_v29 = vsel %vm103_vm4, 2, %v398_v24  ;;  %v108_v30 = vsel %vm104_vm5, 2, %v398_v24  ;;  %v109_v31 = vsel %vm105_vm6, 2, %v398_v24  ;;  %v110_v32 = vsel %vm106_vm7, 2, %v398_v24  ;;  %v220_v41 = vpop.eup %219 }
  0x58   :  { %v111_v33 = vadd.s32 %v107_v29, %v99_v25  ;;  %v112_v34 = vadd.s32 %v108_v30, %v100_v26  ;;  %v113_v35 = vadd.s32 %v109_v31, %v101_v27  ;;  %v114_v36 = vadd.s32 %v110_v32, %v102_v28  ;;  %v222_v46 = vpop.eup %221  ;;  %s399_s4 = smov [#allocation11]   ;;  %s400_s10 = smov [#allocation13]  }
  0x59   :  { %vm115_vm8 = vcmp.eq.f32.partialorder %v466_v0, %v468_v1  ;;  %vm116_vm9 = vcmp.eq.f32.partialorder %v470_v2, %v474_v4  ;;  %vm117_vm10 = vcmp.eq.f32.partialorder %v476_v5, %v478_v6  ;;  %vm118_vm11 = vcmp.eq.f32.partialorder %v489_v12, %v491_v13  ;;  %s172_s26 = sshll.u32 %s399_s4, 4  ;;  %v224_v48 = vpop.eup %223  ;;  %s185_s11 = sshll.u32 %s400_s10, 4  ;;  %s173_s26 = int_to_ptr.vmem [resolvable:$true] %s172_s26  ;;  %s186_s11 = int_to_ptr.vmem [resolvable:$true] %s185_s11 }
  0x5a   :  { %v119_v37 = vsel %vm115_vm8, 4, %v398_v24  ;;  %v120_v38 = vsel %vm116_vm9, 4, %v398_v24  ;;  %v121_v39 = vsel %vm117_vm10, 4, %v398_v24  ;;  %v122_v40 = vsel %vm118_vm11, 4, %v398_v24  ;;  %v226_v52 = vpop.eup %225  ;;  %s337_s12 = scalar_lea.vmem %s173_s26, 512  ;;  %p342_p13 = scmp.lt.s32.totalorder %s173_s26, %s173_s26 }
  0x5b   :  { %v123_v42 = vadd.s32 %v119_v37, %v111_v33  ;;  %v124_v43 = vadd.s32 %v120_v38, %v112_v34  ;;  %v125_v44 = vadd.s32 %v121_v39, %v113_v35  ;;  %v126_v45 = vadd.s32 %v122_v40, %v114_v36  ;;  %p338_p12 = scmp.ne.s32.totalorder %s173_s26, %s337_s12  ;;  %p343_p0 = scmp.lt.s32.totalorder %s337_s12, %s337_s12 }
  0x5c   :  { %v84_v47 = vmul.f32 %v220_v41, %v466_v0  ;;  %v86_v49 = vmul.f32 %v222_v46, %v470_v2  ;;  %v88_v53 = vmul.f32 %v224_v48, %v476_v5  ;;  %v90_v54 = vmul.f32 %v226_v52, %v489_v12 }
  0x5d   :  { %v127_v50 = vpack.c.b16 %v124_v43, %v123_v42  ;;  %v128_v51 = vpack.c.b16 %v126_v45, %v125_v44  ;;  %p344_p1 = por %p343_p0, %p342_p13 }
  0x5e   :  { %91 = vst [vmem:[#allocation11] sm:$0xff] %v84_v47  ;;  %92 = vst [vmem:[#allocation11 + $0x8] sm:$0xff] %v86_v49 }
  0x5f   :  { %v129_v55 = vpack.c.b8 %v128_v51, %v127_v50  ;;  %93 = vst [vmem:[#allocation11 + $0x10] sm:$0xff] %v88_v53  ;;  %94 = vst [vmem:[#allocation11 + $0x18] sm:$0xff] %v90_v54  ;;  %p345_p2 = pnand %p344_p1, %p338_p12 }
  0x61   :  { %130 = vst [vmem:[#allocation13] sm:$0xff] %v129_v55 }
  0x62   :  { %348 = shalt.err (!%p345_p2)
}
  0x63   :  { %s349_s3 = scalar_lea.hbm %s660_s5, 512 }
  0x64   :  { %p350_p3 = scmp.ne.s32.totalorder %s660_s5, %s349_s3  ;;  %p353_p4 = scmp.lt.u32.totalorder %s349_s3, %s660_s5 }
  0x66   :  { %p355_p5 = pnand %p353_p4, %p350_p3 }
  0x68   :  { %358 = shalt.err (!%p355_p5)
}
  0x69   :  { %178 = dma.vmem_to_hbm [thread:$0]  %s173_s26, 512, %s660_s5, [#allocation12], %s392_s7, %s392_s7, %s393_s8  }
  0x6a   :  { %s359_s0 = scalar_lea.vmem %s186_s11, 128  ;;  %p364_p7 = scmp.lt.s32.totalorder %s186_s11, %s186_s11 }
  0x6b   :  { %p360_p6 = scmp.ne.s32.totalorder %s186_s11, %s359_s0  ;;  %p365_p8 = scmp.lt.s32.totalorder %s359_s0, %s359_s0 }
  0x6d   :  { %p366_p9 = por %p365_p8, %p364_p7 }
  0x6f   :  { %p367_p10 = pnand %p366_p9, %p360_p6 }
  0x71   :  { %370 = shalt.err (!%p367_p10)
}
  0x72   :  { %s371_s23 = scalar_lea.hbm %s661_s6, 128 }
  0x73   :  { %p372_p11 = scmp.ne.s32.totalorder %s661_s6, %s371_s23  ;;  %p375_p12 = scmp.lt.u32.totalorder %s371_s23, %s661_s6 }
  0x75   :  { %p377_p13 = pnand %p375_p12, %p372_p11 }
  0x77   :  { %380 = shalt.err (!%p377_p13)
}
  0x78   :  { %188 = dma.vmem_to_hbm [thread:$0]  %s186_s11, 128, %s661_s6, [#allocation12]  }
  0x79   :  { %385 = dma.done.wait [#allocation4], 512  }
  0x7a   :  { %386 = vsyncadd [#allocation4], 4294966784 }
  0x7b   :  { %387 = dma.done.wait [#allocation9], 1024  }
  0x7c   :  { %388 = vsyncadd [#allocation9], 4294966272 }
  0x7d   :  { %389 = dma.done.wait [#allocation12], 640  }
  0x7e   :  { %390 = vsyncadd [#allocation12], 4294966656 }
  0x7f   :  { %204 = vsyncpa [#allocation3], 1 }
  0x80   :  { %205 = vsyncpa [#allocation6], 1 }
  0x81   :  { %206 = vsyncpa [#allocation4], 1 }
  0x82   :  { %207 = vsyncpa [#allocation9], 1 }
  0x83   :  { %208 = vsyncpa [#allocation12], 1 }

</bundles_post_ra>
